<compile_context>
chip_gen: v6e
topology: v6e:2x2x1
jax: 0.10.0
libtpu: 0.0.40
codegen_flags: <defaults>
</compile_context>

<pallas_src>
import functools

import jax
import jax.numpy as jnp
from jax.experimental import pallas as pl
from jax.experimental.pallas import tpu as pltpu


def _encoder_layer_kernel(
    x_ref,        # (1, T, d_model)           f32
    ln1_w_ref,    # (1, d_model)              f32
    ln1_b_ref,    # (1, d_model)              f32
    wq_ref,       # (n_head, d_model, d_k)    bf16  (1/temperature already folded in)
    wk_ref,       # (n_head, d_model, d_k)    bf16
    wv_ref,       # (n_head, d_model, d_v)    bf16
    fc_ref,       # (n_head, d_v, d_model)    bf16
    ln2_w_ref,    # (1, d_model)              f32
    ln2_b_ref,    # (1, d_model)              f32
    w1_ref,       # (d_model, d_inner)        bf16
    b1_ref,       # (1, d_inner)              f32
    w2_ref,       # (d_inner, d_model)        bf16
    b2_ref,       # (1, d_model)              f32
    out_ref,      # (1, T, d_model)           f32
    attn_ref,     # (1, n_head, T, T)         f32
    *,
    n_head: int,
    d_k: int,
    d_v: int,
    diagonal_attention_mask: bool,
):
    f32, bf16 = jnp.float32, jnp.bfloat16
    x = x_ref[0]                                   # (T, d_model) f32
    T, d_model = x.shape

    # ---- LayerNorm (eps=1e-5, PyTorch default), f32 on the VPU ---------------
    mean = jnp.mean(x, axis=-1, keepdims=True)
    var = jnp.mean((x - mean) ** 2, axis=-1, keepdims=True)
    xn = (x - mean) * jax.lax.rsqrt(var + 1e-5)
    xn = xn * ln1_w_ref[0] + ln1_b_ref[0]

    # ---- Multi-head self-attention (head-batched, bf16 MXU / f32 acc) --------
    # Broadcast the normalized activations once into a head-batched slab so all
    # attention contractions are leading-batch dot_generals (no transposes).
    xh = jnp.broadcast_to(xn.astype(bf16)[None], (n_head, T, d_model))

    qh = jnp.einsum("htd,hdk->htk", xh, wq_ref[...],
                    preferred_element_type=f32)            # (H, T, d_k), scaled
    kh = jnp.einsum("htd,hdk->htk", xh, wk_ref[...],
                    preferred_element_type=f32)            # (H, T, d_k)
    vh = jnp.einsum("htd,hdk->htk", xh, wv_ref[...],
                    preferred_element_type=f32)            # (H, T, d_v)

    scores = jnp.einsum("hqd,hkd->hqk",
                        qh.astype(bf16), kh.astype(bf16),
                        preferred_element_type=f32)        # (H, T, T)

    if diagonal_attention_mask:
        row = jax.lax.broadcasted_iota(jnp.int32, (T, T), 0)
        col = jax.lax.broadcasted_iota(jnp.int32, (T, T), 1)
        scores = jnp.where((row == col)[None, :, :], jnp.float32(-1e9), scores)

    # numerically-stable softmax over the key axis (matches F.softmax)
    scores = scores - jnp.max(scores, axis=-1, keepdims=True)
    e = jnp.exp(scores)
    attn = e * pl.reciprocal(jnp.sum(e, axis=-1, keepdims=True), approx=True)

    # single store of all heads' attention weights for this batch element
    attn_ref[0] = attn

    ctx = jnp.einsum("hqk,hkd->hqd",
                     attn.astype(bf16), vh.astype(bf16),
                     preferred_element_type=f32)           # (H, T, d_v)

    # output projection: concat_h(ctx_h) @ W_fc == sum_h ctx_h @ W_fc[h]
    mha = jnp.sum(
        jnp.einsum("htd,hdm->htm", ctx.astype(bf16), fc_ref[...],
                   preferred_element_type=f32),
        axis=0)                                            # (T, d_model)

    # residual connection (with pre-LayerNorm input, as in the PyTorch module)
    x2 = mha + x

    # ---- Position-wise FFN (its own LayerNorm, eps=1e-6) ----------------------
    mean2 = jnp.mean(x2, axis=-1, keepdims=True)
    var2 = jnp.mean((x2 - mean2) ** 2, axis=-1, keepdims=True)
    xn2 = (x2 - mean2) * jax.lax.rsqrt(var2 + 1e-6)
    xn2 = xn2 * ln2_w_ref[0] + ln2_b_ref[0]

    h1 = jnp.dot(xn2.astype(bf16), w1_ref[...],
                 preferred_element_type=f32) + b1_ref[0]
    h1 = jnp.maximum(h1, 0.0)
    ffn = jnp.dot(h1.astype(bf16), w2_ref[...],
                  preferred_element_type=f32) + b2_ref[0]

    out_ref[0] = ffn + x2


def encoder_layer_pallas(x, params, *, n_head, d_k, d_v,
                         diagonal_attention_mask):
    B, T, d_model = x.shape
    d_inner = params["w1"].shape[1]
    inv_temp = 1.0 / (d_k ** 0.5)

    # Host-side (free) weight preparation:
    #   * reshape attention weights into head-major slabs so the kernel runs
    #     leading-batch contractions with no in-kernel relayouts,
    #   * fold 1/temperature into Wq,
    #   * pre-cast all matmul weights to bf16 (halves weight DMA traffic; the
    #     kernel accumulates in f32 via preferred_element_type).
    bf16 = jnp.bfloat16
    wq_h = ((params["wq"] * inv_temp)
            .reshape(d_model, n_head, d_k).transpose(1, 0, 2).astype(bf16))
    wk_h = params["wk"].reshape(d_model, n_head, d_k).transpose(1, 0, 2).astype(bf16)
    wv_h = params["wv"].reshape(d_model, n_head, d_v).transpose(1, 0, 2).astype(bf16)
    fc_h = params["fc"].reshape(n_head, d_v, d_model).astype(bf16)
    w1_b = params["w1"].astype(bf16)
    w2_b = params["w2"].astype(bf16)

    kernel = functools.partial(
        _encoder_layer_kernel,
        n_head=n_head, d_k=d_k, d_v=d_v,
        diagonal_attention_mask=diagonal_attention_mask,
    )

    def const_spec(shape):
        zeros = (0,) * len(shape)
        return pl.BlockSpec(shape, lambda b, _z=zeros: _z)

    # NOTE: weight blocks use constant index maps; for large d_model/d_inner on
    # v6e/v7x consider pipeline_mode=pl.Buffered(1) + an explicit
    # vmem_limit_bytes budget so invariant weights are not double-buffered.
    grid_spec = pltpu.PrefetchScalarGridSpec(
        num_scalar_prefetch=0,
        grid=(B,),
        in_specs=[
            pl.BlockSpec((1, T, d_model), lambda b: (b, 0, 0)),   # x
            const_spec((1, d_model)),                             # ln1_w
            const_spec((1, d_model)),                             # ln1_b
            const_spec((n_head, d_model, d_k)),                   # wq (head-major)
            const_spec((n_head, d_model, d_k)),                   # wk
            const_spec((n_head, d_model, d_v)),                   # wv
            const_spec((n_head, d_v, d_model)),                   # fc (head-major)
            const_spec((1, d_model)),                             # ln2_w
            const_spec((1, d_model)),                             # ln2_b
            const_spec((d_model, d_inner)),                       # w1
            const_spec((1, d_inner)),                             # b1
            const_spec((d_inner, d_model)),                       # w2
            const_spec((1, d_model)),                             # b2
        ],
        out_specs=[
            pl.BlockSpec((1, T, d_model), lambda b: (b, 0, 0)),
            pl.BlockSpec((1, n_head, T, T), lambda b: (b, 0, 0, 0)),
        ],
    )

    out_shape = (
        jax.ShapeDtypeStruct((B, T, d_model), jnp.float32),
        jax.ShapeDtypeStruct((B, n_head, T, T), jnp.float32),
    )

    return pl.pallas_call(
        kernel,
        grid_spec=grid_spec,
        out_shape=out_shape,
        compiler_params=pltpu.CompilerParams(
            dimension_semantics=("parallel",)),
    )(
        x,
        params["ln1_w"], params["ln1_b"],
        wq_h, wk_h, wv_h, fc_h,
        params["ln2_w"], params["ln2_b"],
        w1_b, params["b1"], w2_b, params["b2"],
    )


# ---------------------------------------------------------------------------
# Pure-JAX reference (mirrors the PyTorch forward, dropout = identity), f32.
# ---------------------------------------------------------------------------
def encoder_layer_ref(x, params, *, n_head, d_k, d_v, diagonal_attention_mask):
    B, T, d_model = x.shape

    def layer_norm(v, w, b, eps):
        m = jnp.mean(v, axis=-1, keepdims=True)
        s = jnp.mean((v - m) ** 2, axis=-1, keepdims=True)
        return (v - m) / jnp.sqrt(s + eps) * w + b

    residual = x
    xn = layer_norm(x, params["ln1_w"][0], params["ln1_b"][0], 1e-5)
    q = (xn @ params["wq"]).reshape(B, T, n_head, d_k).transpose(0, 2, 1, 3)
    k = (xn @ params["wk"]).reshape(B, T, n_head, d_k).transpose(0, 2, 1, 3)
    v = (xn @ params["wv"]).reshape(B, T, n_head, d_v).transpose(0, 2, 1, 3)
    scores = jnp.einsum("bhqd,bhkd->bhqk", q / (d_k ** 0.5), k)
    if diagonal_attention_mask:
        eye = jnp.eye(T, dtype=bool)
        scores = jnp.where(eye[None, None], -1e9, scores)
    attn = jax.nn.softmax(scores, axis=-1)
    ctx = jnp.einsum("bhqk,bhkd->bhqd", attn, v)
    ctx = ctx.transpose(0, 2, 1, 3).reshape(B, T, n_head * d_v)
    mha = ctx @ params["fc"]
    x2 = mha + residual

    xn2 = layer_norm(x2, params["ln2_w"][0], params["ln2_b"][0], 1e-6)
    h1 = jax.nn.relu(xn2 @ params["w1"] + params["b1"][0])
    ffn = h1 @ params["w2"] + params["b2"][0]
    return ffn + x2, attn


if __name__ == "__main__":
    # Small shapes consistent with the module:
    B = 2          # batch
    T = 8          # d_time (sequence length)
    d_model = 32
    d_inner = 64
    n_head = 2
    d_k = 16
    d_v = 16
    diagonal_attention_mask = True

    key = jax.random.PRNGKey(0)
    keys = jax.random.split(key, 10)

    def init(k, shape, scale=0.1):
        return (scale * jax.random.normal(k, shape)).astype(jnp.float32)

    params = {
        "ln1_w": jnp.ones((1, d_model), jnp.float32),
        "ln1_b": jnp.zeros((1, d_model), jnp.float32),
        "wq": init(keys[0], (d_model, n_head * d_k)),
        "wk": init(keys[1], (d_model, n_head * d_k)),
        "wv": init(keys[2], (d_model, n_head * d_v)),
        "fc": init(keys[3], (n_head * d_v, d_model)),
        "ln2_w": jnp.ones((1, d_model), jnp.float32),
        "ln2_b": jnp.zeros((1, d_model), jnp.float32),
        "w1": init(keys[4], (d_model, d_inner)),
        "b1": init(keys[5], (1, d_inner)),
        "w2": init(keys[6], (d_inner, d_model)),
        "b2": init(keys[7], (1, d_model)),
    }

    x = init(keys[8], (B, T, d_model), scale=1.0)

    out, attn = encoder_layer_pallas(
        x, params, n_head=n_head, d_k=d_k, d_v=d_v,
        diagonal_attention_mask=diagonal_attention_mask)
    jax.block_until_ready((out, attn))

    out_ref, attn_ref = encoder_layer_ref(
        x, params, n_head=n_head, d_k=d_k, d_v=d_v,
        diagonal_attention_mask=diagonal_attention_mask)

    # bf16 MXU operands (f32 accumulation) => slightly looser tolerances than
    # the previous all-f32 version.
    assert jnp.allclose(out, out_ref, atol=5e-2, rtol=5e-2), "output mismatch"
    assert jnp.allclose(attn, attn_ref, atol=2e-2, rtol=5e-2), "attn mismatch"

    print("KERNEL_OK")
</pallas_src>

<mosaic_0001>
module attributes {stable_mosaic.version = 11 : i64} {
  func.func @_encoder_layer_kernel(%arg0: i32, %arg1: memref<1x8x32xf32, #tpu.memory_space<vmem>>, %arg2: memref<1x32xf32, #tpu.memory_space<vmem>>, %arg3: memref<1x32xf32, #tpu.memory_space<vmem>>, %arg4: memref<2x32x16xbf16, #tpu.memory_space<vmem>>, %arg5: memref<2x32x16xbf16, #tpu.memory_space<vmem>>, %arg6: memref<2x32x16xbf16, #tpu.memory_space<vmem>>, %arg7: memref<2x16x32xbf16, #tpu.memory_space<vmem>>, %arg8: memref<1x32xf32, #tpu.memory_space<vmem>>, %arg9: memref<1x32xf32, #tpu.memory_space<vmem>>, %arg10: memref<32x64xbf16, #tpu.memory_space<vmem>>, %arg11: memref<1x64xf32, #tpu.memory_space<vmem>>, %arg12: memref<64x32xbf16, #tpu.memory_space<vmem>>, %arg13: memref<1x32xf32, #tpu.memory_space<vmem>>, %arg14: memref<1x8x32xf32, #tpu.memory_space<vmem>>, %arg15: memref<1x2x8x8xf32, #tpu.memory_space<vmem>>) attributes {dimension_semantics = [#tpu.dimension_semantics<parallel>], iteration_bounds = array<i64: 2>, scalar_prefetch = 0 : i64, scratch_operands = 0 : i64, tpu.core_type = #tpu.core_type<tc>, window_params = [{transform_indices = @transform_0, window_bounds = array<i64: 1, 8, 32>}, {pipeline_mode = #tpu.pipeline_mode<synchronous>, transform_indices = @transform_1, window_bounds = array<i64: 1, 32>}, {pipeline_mode = #tpu.pipeline_mode<synchronous>, transform_indices = @transform_2, window_bounds = array<i64: 1, 32>}, {pipeline_mode = #tpu.pipeline_mode<synchronous>, transform_indices = @transform_3, window_bounds = array<i64: 2, 32, 16>}, {pipeline_mode = #tpu.pipeline_mode<synchronous>, transform_indices = @transform_4, window_bounds = array<i64: 2, 32, 16>}, {pipeline_mode = #tpu.pipeline_mode<synchronous>, transform_indices = @transform_5, window_bounds = array<i64: 2, 32, 16>}, {pipeline_mode = #tpu.pipeline_mode<synchronous>, transform_indices = @transform_6, window_bounds = array<i64: 2, 16, 32>}, {pipeline_mode = #tpu.pipeline_mode<synchronous>, transform_indices = @transform_7, window_bounds = array<i64: 1, 32>}, {pipeline_mode = #tpu.pipeline_mode<synchronous>, transform_indices = @transform_8, window_bounds = array<i64: 1, 32>}, {pipeline_mode = #tpu.pipeline_mode<synchronous>, transform_indices = @transform_9, window_bounds = array<i64: 32, 64>}, {pipeline_mode = #tpu.pipeline_mode<synchronous>, transform_indices = @transform_10, window_bounds = array<i64: 1, 64>}, {pipeline_mode = #tpu.pipeline_mode<synchronous>, transform_indices = @transform_11, window_bounds = array<i64: 64, 32>}, {pipeline_mode = #tpu.pipeline_mode<synchronous>, transform_indices = @transform_12, window_bounds = array<i64: 1, 32>}, {transform_indices = @transform_13, window_bounds = array<i64: 1, 8, 32>}, {transform_indices = @transform_14, window_bounds = array<i64: 1, 2, 8, 8>}]} {
    %c0 = arith.constant 0 : index
    %c0_0 = arith.constant 0 : index
    %c0_1 = arith.constant 0 : index
    %0 = vector.load %arg1[%c0, %c0_0, %c0_1] : memref<1x8x32xf32, #tpu.memory_space<vmem>>, vector<1x8x32xf32>
    %1 = vector.shape_cast %0 : vector<1x8x32xf32> to vector<8x32xf32>
    %cst = arith.constant dense<0.000000e+00> : vector<8xf32>
    %2 = vector.multi_reduction <add>, %1, %cst [1] : vector<8x32xf32> to vector<8xf32>
    %3 = vector.shape_cast %2 : vector<8xf32> to vector<8x1xf32>
    %cst_2 = arith.constant 3.200000e+01 : f32
    %4 = vector.broadcast %cst_2 : f32 to vector<8x1xf32>
    %5 = arith.divf %3, %4 : vector<8x1xf32>
    %6 = vector.broadcast %5 : vector<8x1xf32> to vector<8x32xf32>
    %7 = arith.subf %1, %6 : vector<8x32xf32>
    %8 = arith.mulf %7, %7 : vector<8x32xf32>
    %cst_3 = arith.constant dense<0.000000e+00> : vector<8xf32>
    %9 = vector.multi_reduction <add>, %8, %cst_3 [1] : vector<8x32xf32> to vector<8xf32>
    %10 = vector.shape_cast %9 : vector<8xf32> to vector<8x1xf32>
    %cst_4 = arith.constant 3.200000e+01 : f32
    %11 = vector.broadcast %cst_4 : f32 to vector<8x1xf32>
    %12 = arith.divf %10, %11 : vector<8x1xf32>
    %13 = vector.broadcast %5 : vector<8x1xf32> to vector<8x32xf32>
    %14 = arith.subf %1, %13 : vector<8x32xf32>
    %cst_5 = arith.constant 9.99999974E-6 : f32
    %15 = vector.broadcast %cst_5 : f32 to vector<8x1xf32>
    %16 = arith.addf %12, %15 : vector<8x1xf32>
    %17 = math.rsqrt %16 : vector<8x1xf32>
    %18 = vector.broadcast %17 : vector<8x1xf32> to vector<8x32xf32>
    %19 = arith.mulf %14, %18 : vector<8x32xf32>
    %c0_6 = arith.constant 0 : index
    %c0_7 = arith.constant 0 : index
    %20 = vector.load %arg2[%c0_6, %c0_7] : memref<1x32xf32, #tpu.memory_space<vmem>>, vector<1x32xf32>
    %21 = vector.shape_cast %20 : vector<1x32xf32> to vector<32xf32>
    %22 = vector.shape_cast %21 : vector<32xf32> to vector<1x32xf32>
    %23 = vector.broadcast %22 : vector<1x32xf32> to vector<8x32xf32>
    %24 = arith.mulf %19, %23 : vector<8x32xf32>
    %c0_8 = arith.constant 0 : index
    %c0_9 = arith.constant 0 : index
    %25 = vector.load %arg3[%c0_8, %c0_9] : memref<1x32xf32, #tpu.memory_space<vmem>>, vector<1x32xf32>
    %26 = vector.shape_cast %25 : vector<1x32xf32> to vector<32xf32>
    %27 = vector.shape_cast %26 : vector<32xf32> to vector<1x32xf32>
    %28 = vector.broadcast %27 : vector<1x32xf32> to vector<8x32xf32>
    %29 = arith.addf %24, %28 : vector<8x32xf32>
    %30 = arith.truncf %29 : vector<8x32xf32> to vector<8x32xbf16>
    %31 = vector.shape_cast %30 : vector<8x32xbf16> to vector<1x8x32xbf16>
    %32 = vector.shape_cast %31 : vector<1x8x32xbf16> to vector<1x8x32xbf16>
    %33 = vector.broadcast %32 : vector<1x8x32xbf16> to vector<2x8x32xbf16>
    %c0_10 = arith.constant 0 : index
    %c0_11 = arith.constant 0 : index
    %c0_12 = arith.constant 0 : index
    %34 = vector.load %arg4[%c0_10, %c0_11, %c0_12] : memref<2x32x16xbf16, #tpu.memory_space<vmem>>, vector<2x32x16xbf16>
    "tpu.trace_start"() <{level = 10 : i32, message = "htd,hdk->htk"}> : () -> ()
    %cst_13 = arith.constant dense<0.000000e+00> : vector<2x8x16xf32>
    %35 = tpu.matmul %33, %34, %cst_13 {dimension_numbers = #tpu.dot_dimension_numbers<[2], [1], [1], [2], [0, 0, 0, 1, 1, 2], [0], [0]>} : vector<2x8x32xbf16>, vector<2x32x16xbf16>, vector<2x8x16xf32> -> vector<2x8x16xf32>
    "tpu.trace_stop"() : () -> ()
    %c0_14 = arith.constant 0 : index
    %c0_15 = arith.constant 0 : index
    %c0_16 = arith.constant 0 : index
    %36 = vector.load %arg5[%c0_14, %c0_15, %c0_16] : memref<2x32x16xbf16, #tpu.memory_space<vmem>>, vector<2x32x16xbf16>
    "tpu.trace_start"() <{level = 10 : i32, message = "htd,hdk->htk"}> : () -> ()
    %cst_17 = arith.constant dense<0.000000e+00> : vector<2x8x16xf32>
    %37 = tpu.matmul %33, %36, %cst_17 {dimension_numbers = #tpu.dot_dimension_numbers<[2], [1], [1], [2], [0, 0, 0, 1, 1, 2], [0], [0]>} : vector<2x8x32xbf16>, vector<2x32x16xbf16>, vector<2x8x16xf32> -> vector<2x8x16xf32>
    "tpu.trace_stop"() : () -> ()
    %c0_18 = arith.constant 0 : index
    %c0_19 = arith.constant 0 : index
    %c0_20 = arith.constant 0 : index
    %38 = vector.load %arg6[%c0_18, %c0_19, %c0_20] : memref<2x32x16xbf16, #tpu.memory_space<vmem>>, vector<2x32x16xbf16>
    "tpu.trace_start"() <{level = 10 : i32, message = "htd,hdk->htk"}> : () -> ()
    %cst_21 = arith.constant dense<0.000000e+00> : vector<2x8x16xf32>
    %39 = tpu.matmul %33, %38, %cst_21 {dimension_numbers = #tpu.dot_dimension_numbers<[2], [1], [1], [2], [0, 0, 0, 1, 1, 2], [0], [0]>} : vector<2x8x32xbf16>, vector<2x32x16xbf16>, vector<2x8x16xf32> -> vector<2x8x16xf32>
    "tpu.trace_stop"() : () -> ()
    %40 = arith.truncf %35 : vector<2x8x16xf32> to vector<2x8x16xbf16>
    %41 = arith.truncf %37 : vector<2x8x16xf32> to vector<2x8x16xbf16>
    "tpu.trace_start"() <{level = 10 : i32, message = "hqd,hkd->hqk"}> : () -> ()
    %cst_22 = arith.constant dense<0.000000e+00> : vector<2x8x8xf32>
    %42 = tpu.matmul %40, %41, %cst_22 {dimension_numbers = #tpu.dot_dimension_numbers<[2], [2], [1], [1], [0, 0, 0, 1, 1, 1], [0], [0]>} : vector<2x8x16xbf16>, vector<2x8x16xbf16>, vector<2x8x8xf32> -> vector<2x8x8xf32>
    "tpu.trace_stop"() : () -> ()
    %43 = tpu.iota {dimensions = array<i32: 0>} : vector<8x8xi32>
    %44 = tpu.iota {dimensions = array<i32: 1>} : vector<8x8xi32>
    %45 = arith.cmpi eq, %43, %44 : vector<8x8xi32>
    %46 = vector.shape_cast %45 : vector<8x8xi1> to vector<1x8x8xi1>
    %cst_23 = arith.constant -1.000000e+09 : f32
    %47 = vector.shape_cast %46 : vector<1x8x8xi1> to vector<1x8x8xi1>
    %48 = vector.broadcast %47 : vector<1x8x8xi1> to vector<2x8x8xi1>
    %49 = vector.broadcast %cst_23 : f32 to vector<2x8x8xf32>
    %50 = arith.select %48, %49, %42 : vector<2x8x8xi1>, vector<2x8x8xf32>
    %cst_24 = arith.constant dense<0xFF800000> : vector<2x8xf32>
    %51 = vector.multi_reduction <maximumf>, %50, %cst_24 [2] : vector<2x8x8xf32> to vector<2x8xf32>
    %52 = vector.shape_cast %51 : vector<2x8xf32> to vector<2x8x1xf32>
    %53 = vector.broadcast %52 : vector<2x8x1xf32> to vector<2x8x8xf32>
    %54 = arith.subf %50, %53 : vector<2x8x8xf32>
    %55 = math.exp %54 : vector<2x8x8xf32>
    %cst_25 = arith.constant dense<0.000000e+00> : vector<2x8xf32>
    %56 = vector.multi_reduction <add>, %55, %cst_25 [2] : vector<2x8x8xf32> to vector<2x8xf32>
    %57 = vector.shape_cast %56 : vector<2x8xf32> to vector<2x8x1xf32>
    %58 = tpu.reciprocal %57 {approx = true} : vector<2x8x1xf32> -> vector<2x8x1xf32>
    %59 = vector.broadcast %58 : vector<2x8x1xf32> to vector<2x8x8xf32>
    %60 = arith.mulf %55, %59 : vector<2x8x8xf32>
    %c0_26 = arith.constant 0 : index
    %c0_27 = arith.constant 0 : index
    %c0_28 = arith.constant 0 : index
    %c0_29 = arith.constant 0 : index
    %61 = vector.load %arg15[%c0_26, %c0_27, %c0_28, %c0_29] : memref<1x2x8x8xf32, #tpu.memory_space<vmem>>, vector<1x2x8x8xf32>
    %62 = vector.shape_cast %61 : vector<1x2x8x8xf32> to vector<2x8x8xf32>
    %63 = vector.shape_cast %60 : vector<2x8x8xf32> to vector<1x2x8x8xf32>
    tpu.vector_store %arg15[%c0_26, %c0_27, %c0_28, %c0_29], %63 {strides = array<i32>} : memref<1x2x8x8xf32, #tpu.memory_space<vmem>>, vector<1x2x8x8xf32>,
    %64 = arith.truncf %60 : vector<2x8x8xf32> to vector<2x8x8xbf16>
    %65 = arith.truncf %39 : vector<2x8x16xf32> to vector<2x8x16xbf16>
    "tpu.trace_start"() <{level = 10 : i32, message = "hqk,hkd->hqd"}> : () -> ()
    %cst_30 = arith.constant dense<0.000000e+00> : vector<2x8x16xf32>
    %66 = tpu.matmul %64, %65, %cst_30 {dimension_numbers = #tpu.dot_dimension_numbers<[2], [1], [1], [2], [0, 0, 0, 1, 1, 2], [0], [0]>} : vector<2x8x8xbf16>, vector<2x8x16xbf16>, vector<2x8x16xf32> -> vector<2x8x16xf32>
    "tpu.trace_stop"() : () -> ()
    %67 = arith.truncf %66 : vector<2x8x16xf32> to vector<2x8x16xbf16>
    %c0_31 = arith.constant 0 : index
    %c0_32 = arith.constant 0 : index
    %c0_33 = arith.constant 0 : index
    %68 = vector.load %arg7[%c0_31, %c0_32, %c0_33] : memref<2x16x32xbf16, #tpu.memory_space<vmem>>, vector<2x16x32xbf16>
    "tpu.trace_start"() <{level = 10 : i32, message = "htd,hdm->htm"}> : () -> ()
    %cst_34 = arith.constant dense<0.000000e+00> : vector<2x8x32xf32>
    %69 = tpu.matmul %67, %68, %cst_34 {dimension_numbers = #tpu.dot_dimension_numbers<[2], [1], [1], [2], [0, 0, 0, 1, 1, 2], [0], [0]>} : vector<2x8x16xbf16>, vector<2x16x32xbf16>, vector<2x8x32xf32> -> vector<2x8x32xf32>
    "tpu.trace_stop"() : () -> ()
    %cst_35 = arith.constant dense<0.000000e+00> : vector<8x32xf32>
    %70 = vector.multi_reduction <add>, %69, %cst_35 [0] : vector<2x8x32xf32> to vector<8x32xf32>
    %71 = arith.addf %70, %1 : vector<8x32xf32>
    %cst_36 = arith.constant dense<0.000000e+00> : vector<8xf32>
    %72 = vector.multi_reduction <add>, %71, %cst_36 [1] : vector<8x32xf32> to vector<8xf32>
    %73 = vector.shape_cast %72 : vector<8xf32> to vector<8x1xf32>
    %cst_37 = arith.constant 3.200000e+01 : f32
    %74 = vector.broadcast %cst_37 : f32 to vector<8x1xf32>
    %75 = arith.divf %73, %74 : vector<8x1xf32>
    %76 = vector.broadcast %75 : vector<8x1xf32> to vector<8x32xf32>
    %77 = arith.subf %71, %76 : vector<8x32xf32>
    %78 = arith.mulf %77, %77 : vector<8x32xf32>
    %cst_38 = arith.constant dense<0.000000e+00> : vector<8xf32>
    %79 = vector.multi_reduction <add>, %78, %cst_38 [1] : vector<8x32xf32> to vector<8xf32>
    %80 = vector.shape_cast %79 : vector<8xf32> to vector<8x1xf32>
    %cst_39 = arith.constant 3.200000e+01 : f32
    %81 = vector.broadcast %cst_39 : f32 to vector<8x1xf32>
    %82 = arith.divf %80, %81 : vector<8x1xf32>
    %83 = vector.broadcast %75 : vector<8x1xf32> to vector<8x32xf32>
    %84 = arith.subf %71, %83 : vector<8x32xf32>
    %cst_40 = arith.constant 9.99999997E-7 : f32
    %85 = vector.broadcast %cst_40 : f32 to vector<8x1xf32>
    %86 = arith.addf %82, %85 : vector<8x1xf32>
    %87 = math.rsqrt %86 : vector<8x1xf32>
    %88 = vector.broadcast %87 : vector<8x1xf32> to vector<8x32xf32>
    %89 = arith.mulf %84, %88 : vector<8x32xf32>
    %c0_41 = arith.constant 0 : index
    %c0_42 = arith.constant 0 : index
    %90 = vector.load %arg8[%c0_41, %c0_42] : memref<1x32xf32, #tpu.memory_space<vmem>>, vector<1x32xf32>
    %91 = vector.shape_cast %90 : vector<1x32xf32> to vector<32xf32>
    %92 = vector.shape_cast %91 : vector<32xf32> to vector<1x32xf32>
    %93 = vector.broadcast %92 : vector<1x32xf32> to vector<8x32xf32>
    %94 = arith.mulf %89, %93 : vector<8x32xf32>
    %c0_43 = arith.constant 0 : index
    %c0_44 = arith.constant 0 : index
    %95 = vector.load %arg9[%c0_43, %c0_44] : memref<1x32xf32, #tpu.memory_space<vmem>>, vector<1x32xf32>
    %96 = vector.shape_cast %95 : vector<1x32xf32> to vector<32xf32>
    %97 = vector.shape_cast %96 : vector<32xf32> to vector<1x32xf32>
    %98 = vector.broadcast %97 : vector<1x32xf32> to vector<8x32xf32>
    %99 = arith.addf %94, %98 : vector<8x32xf32>
    %100 = arith.truncf %99 : vector<8x32xf32> to vector<8x32xbf16>
    %c0_45 = arith.constant 0 : index
    %c0_46 = arith.constant 0 : index
    %101 = vector.load %arg10[%c0_45, %c0_46] : memref<32x64xbf16, #tpu.memory_space<vmem>>, vector<32x64xbf16>
    %cst_47 = arith.constant dense<0.000000e+00> : vector<8x64xf32>
    %102 = tpu.matmul %100, %101, %cst_47 {dimension_numbers = #tpu.dot_dimension_numbers<[1], [0], [0], [1], [0, 0, 1, 1], [], []>} : vector<8x32xbf16>, vector<32x64xbf16>, vector<8x64xf32> -> vector<8x64xf32>
    %c0_48 = arith.constant 0 : index
    %c0_49 = arith.constant 0 : index
    %103 = vector.load %arg11[%c0_48, %c0_49] : memref<1x64xf32, #tpu.memory_space<vmem>>, vector<1x64xf32>
    %104 = vector.shape_cast %103 : vector<1x64xf32> to vector<64xf32>
    %105 = vector.shape_cast %104 : vector<64xf32> to vector<1x64xf32>
    %106 = vector.broadcast %105 : vector<1x64xf32> to vector<8x64xf32>
    %107 = arith.addf %102, %106 : vector<8x64xf32>
    %cst_50 = arith.constant 0.000000e+00 : f32
    %108 = vector.broadcast %cst_50 : f32 to vector<8x64xf32>
    %109 = arith.maximumf %107, %108 : vector<8x64xf32>
    %110 = arith.truncf %109 : vector<8x64xf32> to vector<8x64xbf16>
    %c0_51 = arith.constant 0 : index
    %c0_52 = arith.constant 0 : index
    %111 = vector.load %arg12[%c0_51, %c0_52] : memref<64x32xbf16, #tpu.memory_space<vmem>>, vector<64x32xbf16>
    %cst_53 = arith.constant dense<0.000000e+00> : vector<8x32xf32>
    %112 = tpu.matmul %110, %111, %cst_53 {dimension_numbers = #tpu.dot_dimension_numbers<[1], [0], [0], [1], [0, 0, 1, 1], [], []>} : vector<8x64xbf16>, vector<64x32xbf16>, vector<8x32xf32> -> vector<8x32xf32>
    %c0_54 = arith.constant 0 : index
    %c0_55 = arith.constant 0 : index
    %113 = vector.load %arg13[%c0_54, %c0_55] : memref<1x32xf32, #tpu.memory_space<vmem>>, vector<1x32xf32>
    %114 = vector.shape_cast %113 : vector<1x32xf32> to vector<32xf32>
    %115 = vector.shape_cast %114 : vector<32xf32> to vector<1x32xf32>
    %116 = vector.broadcast %115 : vector<1x32xf32> to vector<8x32xf32>
    %117 = arith.addf %112, %116 : vector<8x32xf32>
    %118 = arith.addf %117, %71 : vector<8x32xf32>
    %c0_56 = arith.constant 0 : index
    %c0_57 = arith.constant 0 : index
    %c0_58 = arith.constant 0 : index
    %119 = vector.load %arg14[%c0_56, %c0_57, %c0_58] : memref<1x8x32xf32, #tpu.memory_space<vmem>>, vector<1x8x32xf32>
    %120 = vector.shape_cast %119 : vector<1x8x32xf32> to vector<8x32xf32>
    %121 = vector.shape_cast %118 : vector<8x32xf32> to vector<1x8x32xf32>
    tpu.vector_store %arg14[%c0_56, %c0_57, %c0_58], %121 {strides = array<i32>} : memref<1x8x32xf32, #tpu.memory_space<vmem>>, vector<1x8x32xf32>,
    return
  }
  func.func @transform_0(%arg0: i32) -> (i32, i32, i32) {
    %c0_i32 = arith.constant 0 : i32
    %c0_i32_0 = arith.constant 0 : i32
    %c0_i32_1 = arith.constant 0 : i32
    return %arg0, %c0_i32, %c0_i32_0 : i32, i32, i32
  }
  func.func @transform_1(%arg0: i32) -> (i32, i32) {
    %c0_i32 = arith.constant 0 : i32
    %c0_i32_0 = arith.constant 0 : i32
    %c0_i32_1 = arith.constant 0 : i32
    return %c0_i32, %c0_i32_0 : i32, i32
  }
  func.func @transform_2(%arg0: i32) -> (i32, i32) {
    %c0_i32 = arith.constant 0 : i32
    %c0_i32_0 = arith.constant 0 : i32
    %c0_i32_1 = arith.constant 0 : i32
    return %c0_i32, %c0_i32_0 : i32, i32
  }
  func.func @transform_3(%arg0: i32) -> (i32, i32, i32) {
    %c0_i32 = arith.constant 0 : i32
    %c0_i32_0 = arith.constant 0 : i32
    %c0_i32_1 = arith.constant 0 : i32
    %c0_i32_2 = arith.constant 0 : i32
    return %c0_i32, %c0_i32_0, %c0_i32_1 : i32, i32, i32
  }
  func.func @transform_4(%arg0: i32) -> (i32, i32, i32) {
    %c0_i32 = arith.constant 0 : i32
    %c0_i32_0 = arith.constant 0 : i32
    %c0_i32_1 = arith.constant 0 : i32
    %c0_i32_2 = arith.constant 0 : i32
    return %c0_i32, %c0_i32_0, %c0_i32_1 : i32, i32, i32
  }
  func.func @transform_5(%arg0: i32) -> (i32, i32, i32) {
    %c0_i32 = arith.constant 0 : i32
    %c0_i32_0 = arith.constant 0 : i32
    %c0_i32_1 = arith.constant 0 : i32
    %c0_i32_2 = arith.constant 0 : i32
    return %c0_i32, %c0_i32_0, %c0_i32_1 : i32, i32, i32
  }
  func.func @transform_6(%arg0: i32) -> (i32, i32, i32) {
    %c0_i32 = arith.constant 0 : i32
    %c0_i32_0 = arith.constant 0 : i32
    %c0_i32_1 = arith.constant 0 : i32
    %c0_i32_2 = arith.constant 0 : i32
    return %c0_i32, %c0_i32_0, %c0_i32_1 : i32, i32, i32
  }
  func.func @transform_7(%arg0: i32) -> (i32, i32) {
    %c0_i32 = arith.constant 0 : i32
    %c0_i32_0 = arith.constant 0 : i32
    %c0_i32_1 = arith.constant 0 : i32
    return %c0_i32, %c0_i32_0 : i32, i32
  }
  func.func @transform_8(%arg0: i32) -> (i32, i32) {
    %c0_i32 = arith.constant 0 : i32
    %c0_i32_0 = arith.constant 0 : i32
    %c0_i32_1 = arith.constant 0 : i32
    return %c0_i32, %c0_i32_0 : i32, i32
  }
  func.func @transform_9(%arg0: i32) -> (i32, i32) {
    %c0_i32 = arith.constant 0 : i32
    %c0_i32_0 = arith.constant 0 : i32
    %c0_i32_1 = arith.constant 0 : i32
    return %c0_i32, %c0_i32_0 : i32, i32
  }
  func.func @transform_10(%arg0: i32) -> (i32, i32) {
    %c0_i32 = arith.constant 0 : i32
    %c0_i32_0 = arith.constant 0 : i32
    %c0_i32_1 = arith.constant 0 : i32
    return %c0_i32, %c0_i32_0 : i32, i32
  }
  func.func @transform_11(%arg0: i32) -> (i32, i32) {
    %c0_i32 = arith.constant 0 : i32
    %c0_i32_0 = arith.constant 0 : i32
    %c0_i32_1 = arith.constant 0 : i32
    return %c0_i32, %c0_i32_0 : i32, i32
  }
  func.func @transform_12(%arg0: i32) -> (i32, i32) {
    %c0_i32 = arith.constant 0 : i32
    %c0_i32_0 = arith.constant 0 : i32
    %c0_i32_1 = arith.constant 0 : i32
    return %c0_i32, %c0_i32_0 : i32, i32
  }
  func.func @transform_13(%arg0: i32) -> (i32, i32, i32) {
    %c0_i32 = arith.constant 0 : i32
    %c0_i32_0 = arith.constant 0 : i32
    %c0_i32_1 = arith.constant 0 : i32
    return %arg0, %c0_i32, %c0_i32_0 : i32, i32, i32
  }
  func.func @transform_14(%arg0: i32) -> (i32, i32, i32, i32) {
    %c0_i32 = arith.constant 0 : i32
    %c0_i32_0 = arith.constant 0 : i32
    %c0_i32_1 = arith.constant 0 : i32
    %c0_i32_2 = arith.constant 0 : i32
    return %arg0, %c0_i32, %c0_i32_0, %c0_i32_1 : i32, i32, i32, i32
  }
}

</mosaic_0001>

<bundles_post_ra>
// kernel: tpu_custom_call.1
= control target key start
LH: loop header
LB: loop body
LE: loop exit
PB: predicated region body
PF: predicated region fallthrough
CT: control target
= control target key end

     0   :  { %s2250_s0 = inlined_call_operand.vmem [shape: f32[2,8,32], index: 0, kind: input, shape index: {}]   ;;  %s2251_s1 = inlined_call_operand.vmem [shape: f32[1,32], index: 1, kind: input, shape index: {}]   ;;  %s2252_s2 = inlined_call_operand.vmem [shape: f32[1,32], index: 2, kind: input, shape index: {}]   ;;  %s2253_s3 = inlined_call_operand.vmem [shape: bf16[2,32,16], index: 3, kind: input, shape index: {}]   ;;  %s2254_s4 = inlined_call_operand.vmem [shape: bf16[2,32,16], index: 4, kind: input, shape index: {}]   ;;  %s2255_s5 = inlined_call_operand.vmem [shape: bf16[2,32,16], index: 5, kind: input, shape index: {}]   ;;  %s2256_s6 = inlined_call_operand.vmem [shape: bf16[2,16,32], index: 6, kind: input, shape index: {}]   ;;  %s2257_s7 = inlined_call_operand.vmem [shape: f32[1,32], index: 7, kind: input, shape index: {}]   ;;  %s2258_s8 = inlined_call_operand.vmem [shape: f32[1,32], index: 8, kind: input, shape index: {}]   ;;  %s2259_s9 = inlined_call_operand.vmem [shape: bf16[32,64], index: 9, kind: input, shape index: {}]   ;;  %s2260_s10 = inlined_call_operand.vmem [shape: f32[1,64], index: 10, kind: input, shape index: {}]   ;;  %s2261_s11 = inlined_call_operand.vmem [shape: bf16[64,32], index: 11, kind: input, shape index: {}]   ;;  %s2262_s12 = inlined_call_operand.vmem [shape: f32[1,32], index: 12, kind: input, shape index: {}]   ;;  %s2263_s13 = inlined_call_operand.hbm [shape: f32[2,8,32], index: 13, kind: output, shape index: {0}]   ;;  %s2264_s14 = inlined_call_operand.hbm [shape: f32[2,2,8,8], index: 14, kind: output, shape index: {1}]  }
   0x1   :  { %2265 = sst [smem:[#allocation8_spill]] %s2250_s0 }
   0x2   :  { %2266 = sst [smem:[#allocation9_spill]] %s2251_s1 }
   0x3   :  { %2267 = sst [smem:[#allocation10_spill]] %s2252_s2 }
   0x4   :  { %2268 = sst [smem:[#allocation11_spill]] %s2253_s3 }
   0x5   :  { %2269 = sst [smem:[#allocation12_spill]] %s2254_s4 }
   0x6   :  { %2270 = sst [smem:[#allocation13_spill]] %s2255_s5 }
   0x7   :  { %2271 = sst [smem:[#allocation14_spill]] %s2256_s6 }
   0x8   :  { %2272 = sst [smem:[#allocation15_spill]] %s2257_s7 }
   0x9   :  { %20 = vsyncpa [#allocation3], 0 }
   0xa   :  { %22 = vsyncpa [#allocation3 + $0x1], 0 }
   0xb   :  { %23 = vsyncpa [#allocation5], 0 }
   0xc   :  { %25 = vsyncpa [#allocation5 + $0x1], 0  ;;  %s1942_s29 = smov 0   ;;  %s1944_s30 = smov 0  }
   0xd   :  { %s1946_s15 = smov 0   ;;  %s1948_s16 = smov 0  }
   0xe LB: > { %s1963_s17 = sadd.s32 4294967295, %s1859_s16   ;;  %s1492_s18 = sadd.s32 4294967294, %s1859_s16   ;;  %s1859_s16 = sphi %s1948_s16, %s2287_s16   ;;  %s1855_s15 = sphi %s1946_s15, %s2286_s15   ;;  %s1851_s30 = sphi %s1944_s30, %s2285_s30   ;;  %s1847_s29 = sphi %s1942_s29, %s2284_s29  }
   0xf   : > { %s1967_s19 = sadd.s32 1, %s1859_s16   ;;  %s316_s20 = sadd.s32 1, %s1855_s15 }
  0x10   : > { %s313_s21 = ssub.s32 %s1859_s16, %s1967_s19  ;;  %p326_p0 = scmp.ne.s32.totalorder %s1855_s15, %s1851_s30 }
  0x11   : > { %p314_p1 = scmp.eq.s32.totalorder %s313_s21, 0  ;;  %p327_p2 = scmp.eq.s32.totalorder %s1963_s17, 1 }
  0x12   : > { %p332_p3 = scmp.ne.s32.totalorder %s1851_s30, %s1847_s29  ;;  %p333_p4 = scmp.eq.s32.totalorder %s1492_s18, 1 }
  0x13   : > { %s1978_s22 = scalar_select %p314_p1, %s1855_s15, %s316_s20  }
  0x14   : > { %p1980_p5 = por %p327_p2, %p326_p0  ;;  %p1984_p6 = por %p333_p4, %p332_p3 }
  0x15   : > { %p1495_p7 = scmp.ge.s32.totalorder %s1859_s16, 1  ;;  %p420_p8 = scmp.lt.s32.totalorder %s1859_s16, 3 }
  0x17   : > { %p421_p9 = pnand %p1495_p7, %p420_p8 }
  0x18   : > { %p470_p10 = scmp.lt.s32.totalorder (!%p421_p9), %s1963_s17, 1  ;;  %s2275_s0 = sld [smem:[#allocation8_spill]] (!%p421_p9) }
  0x19   : > { %424 = sbr.rel (%p421_p9) target bundleno = 2181 (0x885), region = 72  ;;  %s2276_s3 = sld [smem:[#allocation11_spill]] (!%p421_p9) }
  0x1a   : > { %s2277_s1 = sld [smem:[#allocation9_spill]] (!%p421_p9)  ;;  %s1546_s20 = sshll.u32 (!%p421_p9), %s1963_s17, 8 }
  0x1b   : > { %s2278_s2 = sld [smem:[#allocation10_spill]] (!%p421_p9) }
  0x1c   : > { %s2279_s4 = sld [smem:[#allocation12_spill]] (!%p421_p9) }
  0x1d   : > { %s2280_s5 = sld [smem:[#allocation13_spill]] (!%p421_p9) }
  0x1e   : > { %s471_s25 = scalar_select %p470_p10, %s1963_s17, 1  ;;  %vm476_vm0 = vcmask 261120   ;;  %v1861_v9 = vmov 0.0   ;;  %vm1862_vm1 = vmmov 0   ;;  %vm851_vm2 = vcmask 130048  }
  0x1f   : > { %v1737_v7 = vld [vmem:[%s2276_s3 + $0x8] sm:$0xff]   ;;  %v1738_v8 = vld [vmem:[%s2276_s3 + $0x18] sm:$0xff]   ;;  %1585 = vmatprep.subr.bf16.mxu0 %v1861_v9  ;;  %1593 = vmatprep.subr.bf16.mxu1 %v1861_v9  ;;  %v1739_v10 = vld [vmem:[%s2276_s3] sm:$0xff]   ;;  %vm985_vm3 = vcmask 1043456   ;;  %vm953_vm5 = vcmask 64512   ;;  %s2281_s6 = sld [smem:[#allocation14_spill]] }
  0x20   : > { %s1498_s26 = sshll.u32 %s471_s25, 3  ;;  %1586 = vmatpush3.bf16.msra.mxu0 %v1737_v7  ;;  %1594 = vmatpush3.bf16.msra.mxu1 %v1738_v8  ;;  %v1740_v11 = vld [vmem:[%s2276_s3 + $0x10] sm:$0xff]   ;;  %v1499_v16 = vld [vmem:[%s2277_s1] ss:$0 sm:$0xff]  ;;  %s2282_s7 = sld [smem:[#allocation15_spill]]  ;;  %vm1320_vm6 = vcmask 523264  }
  0x21   : > { %s473_s18 = scalar_lea.vmem %s2275_s0, %s1498_s26  ;;  %1587 = vmatprep.subr.bf16.mxu0 %v1861_v9  ;;  %1595 = vmatprep.subr.bf16.mxu1 %v1861_v9  ;;  %v1500_v18 = vld [vmem:[%s2278_s2] ss:$0 sm:$0xff]  ;;  %s2096_s0 = sand.u32 1, %s1851_s30  }
  0x22   : > { %v1995_v0 = vld [vmem:[%s473_s18] sm:$0xff]  ;;  %1589 = vmatprep.mubr.msk.bf16.mxu0 %vm1862_vm1, %v1861_v9  ;;  %1597 = vmatprep.mubr.msk.bf16.mxu1 %vm1862_vm1, %v1861_v9  ;;  %v1741_v21 = vld [vmem:[%s2279_s4 + $0x8] sm:$0xff]   ;;  %v1742_v22 = vld [vmem:[%s2279_s4 + $0x18] sm:$0xff]   ;;  %s1497_s28 = sshll.u32 %s2096_s0, 4  ;;  %s2171_s25 = scalar_lea.hbm %s2264_s14, %s1546_s20 }
  0x23   : > { %v477_v1 = vsel %vm476_vm0, %v1995_v0, 0.0  ;;  %v1743_v24 = vld [vmem:[%s2279_s4] sm:$0xff]   ;;  %v1744_v25 = vld [vmem:[%s2279_s4 + $0x10] sm:$0xff]   ;;  %v1745_v26 = vld [vmem:[%s2280_s5 + $0x8] sm:$0xff]   ;;  %s2099_s18 = scalar_lea.vmem [#allocation4], %s1497_s28  ;;  %s1863_s28 = smov [#allocation4]  }
  0x24   : > { %478 = vadd.xlane.f32.xlu0 %v477_v1  ;;  %1588 = vmatpush3.bf16.msra.mxu0 %v1739_v10  ;;  %v1746_v27 = vld [vmem:[%s2280_s5 + $0x18] sm:$0xff]   ;;  %v1747_v28 = vld [vmem:[%s2280_s5] sm:$0xff]   ;;  %v1748_v29 = vld [vmem:[%s2280_s5 + $0x10] sm:$0xff]   ;;  %v944_v1 = vlaneseq  ;;  %s1398_s21 = sshll.u32 %s2099_s18, 4  ;;  %s1773_s3 = sshll.u32 %s1863_s28, 4  ;;  %s2173_s21 = int_to_ptr.vmem [resolvable:$true] %s1398_s21  ;;  %s1774_s3 = int_to_ptr.vmem [resolvable:$false] %s1773_s3 }
  0x25   : > { %1596 = vmatpush3.bf16.msra.mxu1 %v1740_v11  ;;  %1601 = vmatprep.subr.bf16.mxu0 %v1861_v9  ;;  %s1769_s27 = scalar_lea.vmem %s2173_s21, 256  ;;  %p1776_p0 = scmp.lt.s32.totalorder %s2173_s21, %s1774_s3 }
  0x26   : > { %1609 = vmatprep.subr.bf16.mxu1 %v1861_v9  ;;  %p1770_p11 = scmp.ne.s32.totalorder %s2173_s21, %s1769_s27 }
  0x28   : > { %p1771_p12 = pnand %p1770_p11, %p1980_p5 }
  0x2a   : > { %p1772_p13 = pneg %p1771_p12 }
  0xad   : > { %v479_v2 = vpop.xlane.xlu0 %478 }
  0xae   : > { %v481_v3 = vmul.f32 0.03125, %v479_v2  ;;  %v945_v2 = vshrl.u32 %v944_v1, 7 }
  0xb0   : > { %v482_v4 = vsub.f32 %v1995_v0, %v481_v3  ;;  %v947_v3 = vand.u32 127, %v944_v1 }
  0xb2   : > { %v483_v5 = vmul.f32 %v482_v4, %v482_v4  ;;  %vm948_vm4 = vcmp.eq.s32.totalorder %v945_v2, %v947_v3  ;;  %v1751_v2 = vld [vmem:[%s2259_s9 + $0x8] sm:$0xff]   ;;  %v1753_v3 = vld [vmem:[%s2261_s11 + $0x18] sm:$0xff]  }
  0xb4   : > { %v484_v6 = vsel %vm476_vm0, %v483_v5, 0.0 }
  0xb5   : > { %485 = vadd.xlane.f32.xlu0 %v484_v6 }
 0x13e   : > { %v486_v12 = vpop.xlane.xlu0 %485 }
 0x13f   : > { %v487_v13 = vmul.f32 0.03125, %v486_v12 }
 0x141   : > { %v488_v14 = vadd.f32 1e-05, %v487_v13 }
 0x143   : > { %1757 = vrsqrt.f32 %v488_v14 }
 0x150   : > { %v1758_v15 = vpop.eup %1757 }
 0x151   : > { %v490_v17 = vmul.f32 %v1758_v15, %v482_v4 }
 0x153   : > { %v498_v19 = vmul.f32 %v1499_v16, %v490_v17 }
 0x155   : > { %v506_v20 = vadd.f32 %v1500_v18, %v498_v19 }
 0x157   : > { %v507_v23 = vpack.c.bf16 %v506_v20, %v506_v20 }
 0x159   : > { %1590 = vmatmul.mubr.msk.bf16.vlgmr.msra.gmra.mxu0 %vm476_vm0, %v507_v23  ;;  %1598 = vmatmul.mubr.msk.bf16.vlgmr.msra.gmra.mxu1 %vm476_vm0, %v507_v23 }
 0x15a   : > { %1602 = vmatpush3.bf16.msra.mxu0 %v1741_v21  ;;  %1610 = vmatpush3.bf16.msra.mxu1 %v1742_v22 }
 0x15b   : > { %1603 = vmatprep.subr.bf16.mxu0 %v1861_v9  ;;  %1611 = vmatprep.subr.bf16.mxu1 %v1861_v9 }
 0x15c   : > { %1605 = vmatprep.mubr.msk.bf16.mxu0 %vm1862_vm1, %v1861_v9  ;;  %1613 = vmatprep.mubr.msk.bf16.mxu1 %vm1862_vm1, %v1861_v9 }
 0x15e   : > { %1604 = vmatpush3.bf16.msra.mxu0 %v1743_v24  ;;  %1612 = vmatpush3.bf16.msra.mxu1 %v1744_v25 }
 0x15f   : > { %1617 = vmatprep.subr.bf16.mxu0 %v1861_v9  ;;  %1625 = vmatprep.subr.bf16.mxu1 %v1861_v9 }
 0x161   : > { %1606 = vmatmul.mubr.msk.bf16.vlgmr.msra.gmra.mxu0 %vm476_vm0, %v507_v23  ;;  %1614 = vmatmul.mubr.msk.bf16.vlgmr.msra.gmra.mxu1 %vm476_vm0, %v507_v23 }
 0x162   : > { %1618 = vmatpush3.bf16.msra.mxu0 %v1745_v26  ;;  %1626 = vmatpush3.bf16.msra.mxu1 %v1746_v27 }
 0x163   : > { %1619 = vmatprep.subr.bf16.mxu0 %v1861_v9  ;;  %1627 = vmatprep.subr.bf16.mxu1 %v1861_v9 }
 0x164   : > { %1621 = vmatprep.mubr.msk.bf16.mxu0 %vm1862_vm1, %v1861_v9  ;;  %1629 = vmatprep.mubr.msk.bf16.mxu1 %vm1862_vm1, %v1861_v9 }
 0x166   : > { %1620 = vmatpush3.bf16.msra.mxu0 %v1747_v28  ;;  %1628 = vmatpush3.bf16.msra.mxu1 %v1748_v29 }
 0x167   : > { %1633 = vmatprep.subr.bf16.mxu0 %v1861_v9  ;;  %1639 = vmatprep.subr.bf16.mxu1 %v1861_v9 }
 0x169   : > { %1622 = vmatmul.mubr.msk.bf16.vlgmr.msra.gmra.mxu0 %vm476_vm0, %v507_v23  ;;  %1630 = vmatmul.mubr.msk.bf16.vlgmr.msra.gmra.mxu1 %vm476_vm0, %v507_v23 }
 0x16a   : > { %1635 = vmatprep.mubr.msk.bf16.mxu0 %vm1862_vm1, %v1861_v9  ;;  %1641 = vmatprep.mubr.msk.bf16.mxu1 %vm1862_vm1, %v1861_v9 }
 0x219   : > { %v565_v30 = vpop.f32.mrf.mxu0  ;;  %v617_v31 = vpop.f32.mrf.mxu1 }
 0x21a   : > { %v847_v52 = vpack.c.bf16 %v565_v30, %v565_v30  ;;  %v848_v53 = vpack.c.bf16 %v617_v31, %v617_v31 }
 0x21b   : > { %v1591_v32 = vpop.f32.mrf.mxu0  ;;  %v1599_v33 = vpop.f32.mrf.mxu1 }
 0x21d   : > { %v568_v34 = vpop.f32.mrf.mxu0  ;;  %v620_v35 = vpop.f32.mrf.mxu1 }
 0x21e   : > { %v1749_v35 = vld [vmem:[%s2281_s6] sm:$0xff]  }
 0x21f   : > { %v1592_v36 = vpop.f32.mrf.mxu0  ;;  %v1600_v37 = vpop.f32.mrf.mxu1 }
 0x220   : > { %v1750_v36 = vld [vmem:[%s2281_s6 + $0x8] sm:$0xff]  }
 0x221   : > { %v677_v38 = vpop.f32.mrf.mxu0  ;;  %v729_v39 = vpop.f32.mrf.mxu1 }
 0x222   : > { %v849_v40 = vpack.c.bf16 %v677_v38, %v677_v38  ;;  %v850_v41 = vpack.c.bf16 %v729_v39, %v729_v39 }
 0x223   : > { %v1607_v42 = vpop.f32.mrf.mxu0  ;;  %v1615_v43 = vpop.f32.mrf.mxu1 }
 0x224   : > { %v856_v44 = vsel %vm851_vm2, %v849_v40, 0  ;;  %v902_v45 = vsel %vm851_vm2, %v850_v41, 0 }
 0x225   : > { %v680_v46 = vpop.f32.mrf.mxu0  ;;  %v732_v47 = vpop.f32.mrf.mxu1  ;;  %1634 = vmatpush3.bf16.xpose.msra.mxu0 %v856_v44  ;;  %1640 = vmatpush3.bf16.xpose.msra.mxu1 %v902_v45 }
 0x226   : > { %1645 = vmatprep.subr.bf16.mxu0 %v1861_v9  ;;  %1651 = vmatprep.subr.bf16.mxu1 %v1861_v9 }
 0x227   : > { %v1608_v48 = vpop.f32.mrf.mxu0  ;;  %v1616_v49 = vpop.f32.mrf.mxu1 }
 0x229   : > { %v789_v50 = vpop.f32.mrf.mxu0  ;;  %v841_v51 = vpop.f32.mrf.mxu1 }
 0x22a   : > { %v980_v54 = vpack.c.bf16 %v789_v50, %v789_v50  ;;  %v981_v55 = vpack.c.bf16 %v841_v51, %v841_v51 }
 0x22b   : > { %v1623_v56 = vpop.f32.mrf.mxu0  ;;  %v1631_v57 = vpop.f32.mrf.mxu1 }
 0x22c   : > { %v987_v58 = vsel %vm985_vm3, %v980_v54, 0  ;;  %v1033_v59 = vsel %vm985_vm3, %v981_v55, 0  ;;  %1636 = vmatmul.mubr.msk.bf16.vlgmr.msra.gmra.mxu0 %vm851_vm2, %v847_v52  ;;  %1642 = vmatmul.mubr.msk.bf16.vlgmr.msra.gmra.mxu1 %vm851_vm2, %v848_v53 }
 0x22d   : > { %v792_v60 = vpop.f32.mrf.mxu0  ;;  %v844_v61 = vpop.f32.mrf.mxu1  ;;  %1646 = vmatpush3.bf16.msra.mxu0 %v987_v58  ;;  %1652 = vmatpush3.bf16.msra.mxu1 %v1033_v59 }
 0x22e   : > { %1647 = vmatprep.mubr.msk.bf16.mxu0 %vm1862_vm1, %v1861_v9  ;;  %1653 = vmatprep.mubr.msk.bf16.mxu1 %vm1862_vm1, %v1861_v9 }
 0x22f   : > { %v1624_v62 = vpop.f32.mrf.mxu0  ;;  %v1632_v63 = vpop.f32.mrf.mxu1  ;;  %1657 = vmatprep.subr.bf16.mxu0 %v1861_v9  ;;  %1663 = vmatprep.subr.bf16.mxu1 %v1861_v9 }
 0x2ec   : > { %v892_v4 = vpop.f32.mrf.mxu0  ;;  %v938_v5 = vpop.f32.mrf.mxu1 }
 0x2ed   : > { %v951_v6 = vsel %vm948_vm4, -1e+09, %v892_v4  ;;  %v952_v11 = vsel %vm948_vm4, -1e+09, %v938_v5  ;;  %v1754_v4 = vld [vmem:[%s2261_s11 + $0x10] sm:$0xff]  }
 0x2ee   : > { %v1637_v7 = vpop.f32.mrf.mxu0  ;;  %v1643_v8 = vpop.f32.mrf.mxu1  ;;  %v954_v10 = vsel %vm953_vm5, %v951_v6, -inf  ;;  %v957_v16 = vsel %vm953_vm5, %v952_v11, -inf }
 0x2ef   : > { %955 = vmax.xlane.f32.xlu1 %v954_v10  ;;  %v1527_v10 = vld [vmem:[%s2282_s7] ss:$0 sm:$0xff] }
 0x2f0   : > { %v895_v12 = vpop.f32.mrf.mxu0  ;;  %v941_v13 = vpop.f32.mrf.mxu1 }
 0x2f1   : > { %v1528_v12 = vld [vmem:[%s2258_s8] ss:$0 sm:$0xff] }
 0x2f2   : > { %v1638_v14 = vpop.f32.mrf.mxu0  ;;  %v1644_v15 = vpop.f32.mrf.mxu1 }
 0x2f3   : > { %958 = vmax.xlane.f32.xlu1 %v957_v16  ;;  %v1755_v16 = vld [vmem:[%s2261_s11 + $0x8] sm:$0xff]  }
 0x378   : > { %v956_v17 = vpop.xlane.xlu1 %955 }
 0x379   : > { %v960_v18 = vsub.f32 %v951_v6, %v956_v17  ;;  %v1756_v17 = vld [vmem:[%s2261_s11] sm:$0xff]  }
 0x37b   : > { %v962_v19 = vmul.f32 1.442695, %v960_v18  ;;  %v1529_v18 = vld [vmem:[%s2260_s10] ss:$0 sm:$0xff] }
 0x37c   : > { %v959_v20 = vpop.xlane.xlu1 %958 }
 0x37d   : > { %1759 = vpow2.f32 %v962_v19  ;;  %v961_v21 = vsub.f32 %v952_v11, %v959_v20 }
 0x37f   : > { %v964_v22 = vmul.f32 1.442695, %v961_v21 }
 0x381   : > { %1761 = vpow2.f32 %v964_v22 }
 0x38a   : > { %v1760_v23 = vpop.eup %1759 }
 0x38b   : > { %v966_v24 = vsel %vm953_vm5, %v1760_v23, 0.0 }
 0x38c   : > { %967 = vadd.xlane.f32.xlu0 %v966_v24 }
 0x38e   : > { %v1762_v25 = vpop.eup %1761 }
 0x38f   : > { %v969_v26 = vsel %vm953_vm5, %v1762_v25, 0.0 }
 0x390   : > { %970 = vadd.xlane.f32.xlu1 %v969_v26 }
 0x415   : > { %v968_v27 = vpop.xlane.xlu0 %967 }
 0x416   : > { %1763 = vrcp.f32 %v968_v27 }
 0x419   : > { %v971_v28 = vpop.xlane.xlu1 %970 }
 0x41a   : > { %1765 = vrcp.f32 %v971_v28 }
 0x423   : > { %v1764_v29 = vpop.eup %1763 }
 0x424   : > { %v974_v30 = vmul.f32 %v1764_v29, %v1760_v23 }
 0x426   : > { %v978_v31 = vpack.c.bf16 %v974_v30, %v974_v30  ;;  %976 = vst.msk [vmem:[%s2099_s18] sm:$0xff] %vm953_vm5, %v974_v30 }
 0x427   : > { %v1766_v32 = vpop.eup %1765 }
 0x428   : > { %1648 = vmatmul.mubr.msk.bf16.vlgmr.msra.gmra.mxu0 %vm953_vm5, %v978_v31  ;;  %v975_v33 = vmul.f32 %v1766_v32, %v1762_v25 }
 0x429   : > { %1659 = vmatprep.mubr.msk.bf16.mxu0 %vm1862_vm1, %v1861_v9  ;;  %1658 = vmatpush3.bf16.msra.mxu0 %v1749_v35 }
 0x42a   : > { %v979_v34 = vpack.c.bf16 %v975_v33, %v975_v33  ;;  %977 = vst.msk [vmem:[%s2099_s18 + $0x8] sm:$0xff] %vm953_vm5, %v975_v33  ;;  %1669 = vmatprep.subr.bf16.mxu0 %v1861_v9  ;;  %s1775_s18 = scalar_lea.vmem %s1774_s3, 512 }
 0x42b   : > { %p1777_p1 = scmp.lt.s32.totalorder %s1775_s18, %s1769_s27 }
 0x42c   : > { %1654 = vmatmul.mubr.msk.bf16.vlgmr.msra.gmra.mxu1 %vm953_vm5, %v979_v34 }
 0x42d   : > { %1665 = vmatprep.mubr.msk.bf16.mxu1 %vm1862_vm1, %v1861_v9  ;;  %1664 = vmatpush3.bf16.msra.mxu1 %v1750_v36  ;;  %p1778_p2 = por %p1777_p1, %p1776_p0 }
 0x42e   : > { %1677 = vmatprep.subr.bf16.mxu1 %v1861_v9 }
 0x42f   : > { %p1779_p3 = pnand %p1778_p2, %p1772_p13 }
 0x4e8   : > { %v1023_v37 = vpop.f32.mrf.mxu0 }
 0x4e9   : > { %v1075_v38 = vpack.c.bf16 %v1023_v37, %v1023_v37 }
 0x4ea   : > { %v1649_v39 = vpop.f32.mrf.mxu0 }
 0x4eb   : > { %1660 = vmatmul.mubr.msk.bf16.vlgmr.msra.gmra.mxu0 %vm851_vm2, %v1075_v38 }
 0x4ec   : > { %v1026_v40 = vpop.f32.mrf.mxu0  ;;  %v1069_v41 = vpop.f32.mrf.mxu1  ;;  %1673 = vmatprep.mubr.msk.bf16.mxu0 %vm1862_vm1, %v1861_v9  ;;  %1670 = vmatpush3.bf16.msra.mxu0 %v1751_v2 }
 0x4ed   : > { %v1076_v42 = vpack.c.bf16 %v1069_v41, %v1069_v41  ;;  %1671 = vmatprep.subr.bf16.mxu0 %v1861_v9 }
 0x4ee   : > { %v1650_v43 = vpop.f32.mrf.mxu0  ;;  %v1655_v44 = vpop.f32.mrf.mxu1 }
 0x4ef   : > { %1666 = vmatmul.mubr.msk.bf16.vlgmr.msra.gmra.mxu1 %vm851_vm2, %v1076_v42 }
 0x4f0   : > { %v1072_v45 = vpop.f32.mrf.mxu1  ;;  %1685 = vmatprep.mubr.msk.bf16.mxu1 %vm1862_vm1, %v1861_v9  ;;  %1678 = vmatpush3.bf16.msra.mxu1 %v1753_v3 }
 0x4f1   : > { %1679 = vmatprep.subr.bf16.mxu1 %v1861_v9 }
 0x4f2   : > { %v1656_v46 = vpop.f32.mrf.mxu1 }
 0x4f4   : > { %1680 = vmatpush3.bf16.msra.mxu1 %v1754_v4 }
 0x4f5   : > { %1681 = vmatprep.subr.bf16.mxu1 %v1861_v9 }
 0x4f8   : > { %1682 = vmatpush3.bf16.msra.mxu1 %v1755_v16 }
 0x4f9   : > { %1683 = vmatprep.subr.bf16.mxu1 %v1861_v9 }
 0x4fc   : > { %1684 = vmatpush3.bf16.msra.mxu1 %v1756_v17 }
 0x5ab   : > { %v1124_v47 = vpop.f32.mrf.mxu0 }
 0x5ac   : > { %v1179_v51 = vsel %vm476_vm0, %v1124_v47, 0.0 }
 0x5ad   : > { %v1661_v48 = vpop.f32.mrf.mxu0 }
 0x5af   : > { %v1127_v49 = vpop.f32.mrf.mxu0  ;;  %v1173_v50 = vpop.f32.mrf.mxu1 }
 0x5b0   : > { %v1180_v52 = vsel %vm476_vm0, %v1173_v50, 0.0 }
 0x5b1   : > { %v1181_v53 = vadd.f32 %v1180_v52, %v1179_v51  ;;  %v1662_v54 = vpop.f32.mrf.mxu0  ;;  %v1667_v55 = vpop.f32.mrf.mxu1 }
 0x5b3   : > { %v2128_v56 = vadd.f32 %v1181_v53, %v1995_v0  ;;  %v1176_v57 = vpop.f32.mrf.mxu1  ;;  %v1752_v0 = vld [vmem:[%s2259_s9] sm:$0xff]  }
 0x5b4   : > { %1672 = vmatpush3.bf16.msra.mxu0 %v1752_v0 }
 0x5b5   : > { %v1668_v58 = vpop.f32.mrf.mxu1  ;;  %v1183_v59 = vsel %vm476_vm0, %v2128_v56, 0.0 }
 0x5b6   : > { %1184 = vadd.xlane.f32.xlu0 %v1183_v59 }
 0x63f   : > { %v1185_v60 = vpop.xlane.xlu0 %1184 }
 0x640   : > { %v1186_v61 = vmul.f32 0.03125, %v1185_v60 }
 0x642   : > { %v1187_v62 = vsub.f32 %v2128_v56, %v1186_v61 }
 0x644   : > { %v1188_v63 = vmul.f32 %v1187_v62, %v1187_v62 }
 0x646   : > { %v1189_v1 = vsel %vm476_vm0, %v1188_v63, 0.0 }
 0x647   : > { %1190 = vadd.xlane.f32.xlu1 %v1189_v1 }
 0x6d0   : > { %v1191_v5 = vpop.xlane.xlu1 %1190 }
 0x6d1   : > { %v1192_v6 = vmul.f32 0.03125, %v1191_v5 }
 0x6d3   : > { %v1193_v7 = vadd.f32 1e-06, %v1192_v6 }
 0x6d5   : > { %1767 = vrsqrt.f32 %v1193_v7 }
 0x6e2   : > { %v1768_v8 = vpop.eup %1767 }
 0x6e3   : > { %v1195_v11 = vmul.f32 %v1768_v8, %v1187_v62 }
 0x6e5   : > { %v1203_v13 = vmul.f32 %v1527_v10, %v1195_v11 }
 0x6e7   : > { %v1211_v14 = vadd.f32 %v1528_v12, %v1203_v13 }
 0x6e9   : > { %v1212_v15 = vpack.c.bf16 %v1211_v14, %v1211_v14 }
 0x6eb   : > { %1674 = vmatmul.mubr.msk.bf16.vlgmr.msra.gmra.mxu0 %vm476_vm0, %v1212_v15 }
 0x7ab   : > { %v1273_v19 = vpop.f32.mrf.mxu0 }
 0x7ac   : > { %v1274_v20 = vadd.f32 %v1529_v18, %v1273_v19 }
 0x7ad   : > { %v1675_v21 = vpop.f32.mrf.mxu0 }
 0x7ae   : > { %v1279_v22 = vmax.f32 %v1274_v20, 0.0 }
 0x7af   : > { %v1276_v23 = vpop.f32.mrf.mxu0 }
 0x7b0   : > { %v1280_v24 = vpack.c.bf16 %v1279_v22, %v1279_v22 }
 0x7b1   : > { %v1676_v25 = vpop.f32.mrf.mxu0 }
 0x7b2   : > { %1686 = vmatmul.mubr.msk.bf16.vlgmr.msra.gmra.mxu1 %vm1320_vm6, %v1280_v24 }
 0x7b3   : > { %1782 = shalt.err (!%p1779_p3)
}
 0x7b4   : > { %s1783_s20 = scalar_lea.hbm %s2171_s25, 256  ;;  %s1787_s28 = scalar_lea.hbm %s2264_s14, 512 }
 0x7b5   : > { %p1784_p4 = scmp.ne.s32.totalorder %s2171_s25, %s1783_s20  ;;  %p1788_p9 = scmp.lt.s32.totalorder %s2171_s25, %s2264_s14 }
 0x7b6   : > { %p1789_p10 = scmp.lt.s32.totalorder %s1787_s28, %s1783_s20 }
 0x7b7   : > { %p1785_p7 = pnand %p1784_p4, %p1980_p5 }
 0x7b8   : > { %p1790_p11 = por %p1789_p10, %p1788_p9 }
 0x7b9   : > { %p1786_p8 = pneg %p1785_p7 }
 0x7bb   : > { %p1791_p12 = pnand %p1790_p11, %p1786_p8 }
 0x7bd   : > { %1794 = shalt.err (!%p1791_p12)
}
 0x7be   : > { %s1864_s3 = smov 128   ;;  %s1865_s27 = smov 8   ;;  %v1533_v9 = vld [vmem:[%s2262_s12] ss:$0 sm:$0xff] }
 0x7bf   : > { %s2283_s18 = scalar_lea.sflag [#allocation5], %s2096_s0  ;;  %s1496_s1 = sshll.u32 %s2096_s0, 3 }
 0x7c0   : > { %1690 = dma.vmem_to_hbm [thread:$0]  (%p1980_p5), %s2173_s21, 256, %s2171_s25, %s2283_s18, %s1864_s3, %s1864_s3, %s1865_s27  }
 0x7c1   : > { %s1541_s26 = sshll.u32 %s1963_s17, 7  ;;  %s462_s20 = scalar_lea.vmem [#allocation2], %s1496_s1 }
 0x7c2   : > { %s1385_s28 = sshll.u32 %s462_s20, 4  ;;  %s2207_s7 = scalar_lea.hbm %s2263_s13, %s1541_s26  ;;  %s2209_s28 = int_to_ptr.vmem [resolvable:$true] %s1385_s28 }
 0x7c3   : > { %s1367_s17 = scalar_lea.sflag [#allocation3], %s2096_s0  ;;  %s1795_s21 = scalar_lea.vmem %s2209_s28, 128 }
 0x7c4   : > { %p1796_p13 = scmp.ne.s32.totalorder %s2209_s28, %s1795_s21  ;;  %s1866_s25 = smov [#allocation2]  }
 0x7c5   : > { %s1799_s3 = sshll.u32 %s1866_s25, 4  ;;  %s1800_s3 = int_to_ptr.vmem [resolvable:$false] %s1799_s3 }
 0x7c6   : > { %p1797_p0 = pnand %p1796_p13, %p1980_p5  ;;  %s1801_s5 = scalar_lea.vmem %s1800_s3, 256 }
 0x7c7   : > { %p1802_p2 = scmp.lt.s32.totalorder %s2209_s28, %s1800_s3  ;;  %p1803_p3 = scmp.lt.s32.totalorder %s1801_s5, %s1795_s21 }
 0x7c8   : > { %p1798_p1 = pneg %p1797_p0 }
 0x7c9   : > { %p1804_p4 = por %p1803_p3, %p1802_p2 }
 0x7cb   : > { %p1805_p7 = pnand %p1804_p4, %p1798_p1 }
 0x872   : > { %v1358_v26 = vpop.f32.mrf.mxu1 }
 0x873   : > { %v1359_v27 = vadd.f32 %v1533_v9, %v1358_v26 }
 0x874   : > { %v1687_v28 = vpop.f32.mrf.mxu1 }
 0x875   : > { %v1364_v29 = vadd.f32 %v1359_v27, %v2128_v56 }
 0x876   : > { %v1361_v30 = vpop.f32.mrf.mxu1 }
 0x877   : > { %1365 = vst.msk [vmem:[%s462_s20] sm:$0xff] %vm476_vm0, %v1364_v29 }
 0x878   : > { %v1688_v31 = vpop.f32.mrf.mxu1 }
 0x879   : > { %1808 = shalt.err (!%p1805_p7)
}
 0x87a   : > { %s1809_s6 = scalar_lea.hbm %s2207_s7, 128  ;;  %s1813_s18 = scalar_lea.hbm %s2263_s13, 256 }
 0x87b   : > { %p1810_p8 = scmp.ne.s32.totalorder %s2207_s7, %s1809_s6  ;;  %p1814_p11 = scmp.lt.s32.totalorder %s2207_s7, %s2263_s13 }
 0x87c   : > { %p1815_p12 = scmp.lt.s32.totalorder %s1813_s18, %s1809_s6 }
 0x87d   : > { %p1811_p9 = pnand %p1810_p8, %p1980_p5 }
 0x87e   : > { %p1816_p13 = por %p1815_p12, %p1814_p11 }
 0x87f   : > { %p1812_p10 = pneg %p1811_p9 }
 0x881   : > { %p1817_p0 = pnand %p1816_p13, %p1812_p10 }
 0x883   : > { %1820 = shalt.err (!%p1817_p0)
}
 0x884   : > { %1689 = dma.vmem_to_hbm [thread:$0]  (%p1980_p5), %s2209_s28, 128, %s2207_s7, %s1367_s17  }
 0x885 PF: > { %p1700_p1 = scmp.ge.s32.totalorder %s1859_s16, 2  ;;  %s1413_s4 = sand.u32 1, %s1847_s29  }
 0x886   : > { %s1414_s26 = scalar_lea.sflag [#allocation3], %s1413_s4 }
 0x887   : > { %p1694_p2 = pnand %p1700_p1, %p1984_p6 }
 0x889   : > { %p1695_p3 = pneg %p1694_p2 }
 0x88b   : > { %1838 = dma.done.wait (%p1695_p3), %s1414_s26, 128  }
 0x88c   : > { %1840 = vsyncadd (%p1695_p3), %s1414_s26, 4294967168  ;;  %s1423_s20 = scalar_lea.sflag [#allocation5], %s1413_s4 }
 0x88d   : > { %1842 = dma.done.wait (%p1695_p3), %s1423_s20, 256  }
 0x88e   : > { %1844 = vsyncadd (%p1695_p3), %s1423_s20, 4294967040  ;;  %p28_p5 = scmp.ge.s32.totalorder %s1967_s19, 4   ;;  %s2284_s29 = smov %s1851_s30 }
 0x88f   : > { %s2285_s30 = smov %s1855_s15  ;;  %s2286_s15 = smov %s1978_s22 }
 0x890   : > { %s2287_s16 = smov %s1967_s19  ;;  %30 = sbr.rel (!%p28_p5) target bundleno = 14 (0xe), region = 124 }
 0x895   :  { %1428 = vsyncpa [#allocation3], 1 }
 0x896   :  { %1430 = vsyncpa [#allocation3 + $0x1], 1 }
 0x897   :  { %1431 = vsyncpa [#allocation5], 1 }
 0x898   :  { %1433 = vsyncpa [#allocation5 + $0x1], 1 }

</bundles_post_ra>
